<compile_context>
chip_gen: v7x
topology: tpu7x:2x2x1
jax: 0.10.0
libtpu: 0.0.40
codegen_flags: <defaults>
</compile_context>

<pallas_src>
import jax
import jax.numpy as jnp
from jax import lax
from jax.experimental import pallas as pl
from jax.experimental.pallas import tpu as pltpu

# ----------------------- model hyper-parameters (small) -----------------------
INPUT_DIM = 8            # number of tokens == number of labels
CODEBERT_OUT = 120       # codebert_output_dim
D_OUT = 16               # d  (final output size)
EMB_DIM = 128            # surrogate backbone embedding width
VOCAB = 64               # surrogate vocab size

C_PAD = 128              # lane-padded width of (codebert_output_dim + input_dim)
OUT_PAD = 128            # lane-padded width of the final output
assert CODEBERT_OUT + INPUT_DIM == C_PAD


# ------------------------------- fused kernel ---------------------------------
def fused_forward_kernel(tok_ref,      # SMEM (INPUT_DIM,) int32  [scalar prefetch]
                         emb_ref,      # VMEM (VOCAB, EMB_DIM) f32
                         labels_ref,   # VMEM (1, C_PAD) f32, labels in lanes 120..127
                         wp_ref,       # VMEM (EMB_DIM, C_PAD) bf16, cols 120..127 == 0
                         bp_ref,       # VMEM (1, C_PAD) f32, lanes 120..127 == 0
                         wl_ref,       # VMEM (C_PAD, OUT_PAD) bf16, cols 16..127 == 0
                         bl_ref,       # VMEM (1, OUT_PAD) f32, lanes 16..127 == 0
                         o_ref):       # VMEM (1, OUT_PAD) f32
    # --- surrogate backbone pooling: gather 8 embedding rows + mean ---
    def body(i, acc):
        row = emb_ref[pl.ds(tok_ref[i], 1), :]          # (1, EMB_DIM) f32
        return acc + row
    pooled = lax.fori_loop(0, INPUT_DIM, body,
                           jnp.zeros((1, EMB_DIM), jnp.float32), unroll=True)
    pooled = pooled * (1.0 / INPUT_DIM)

    # --- h = tanh(pooled @ Wp + bp); padded lanes 120..127 stay exactly 0 ---
    h = jnp.tanh(
        jnp.dot(pooled.astype(jnp.bfloat16), wp_ref[...],
                preferred_element_type=jnp.float32)
        + bp_ref[...]
    )

    # --- torch.cat((model_output, labels)) is a free vector add:
    #     h has zeros in lanes 120..127, labels_ref has zeros in lanes 0..119 ---
    ll = h + labels_ref[...]                            # (1, C_PAD) f32

    # --- final Linear(128 -> 16), lane-padded to 128 for an unmasked store ---
    o_ref[...] = (
        jnp.dot(ll.astype(jnp.bfloat16), wl_ref[...],
                preferred_element_type=jnp.float32)
        + bl_ref[...]
    )


# ------------------------------ parameter setup ------------------------------
def init_params(key):
    k_emb, k_wp, k_bp, k_wl, k_bl = jax.random.split(key, 5)

    # surrogate backbone embedding table (kept f32: tiny, and avoids dynamic
    # sublane slicing of a packed dtype)
    emb = jax.random.normal(k_emb, (VOCAB, EMB_DIM), jnp.float32) * 0.02

    # projection head -> codebert_output_dim, lane-padded 120 -> 128 with zeros
    w_proj = jax.random.normal(k_wp, (EMB_DIM, CODEBERT_OUT), jnp.float32) * 0.05
    b_proj = jax.random.normal(k_bp, (CODEBERT_OUT,), jnp.float32) * 0.01
    w_proj_p = jnp.pad(w_proj, ((0, 0), (0, C_PAD - CODEBERT_OUT))).astype(jnp.bfloat16)
    b_proj_p = jnp.pad(b_proj, (0, C_PAD - CODEBERT_OUT)).reshape(1, C_PAD)

    # self.layer = Linear(codebert_output_dim + input_dim, d)
    # stored transposed to (in_features, out_features); out lane-padded 16 -> 128
    w_layer = jax.random.normal(
        k_wl, (CODEBERT_OUT + INPUT_DIM, D_OUT), jnp.float32) * 0.05
    b_layer = jax.random.normal(k_bl, (D_OUT,), jnp.float32) * 0.01
    w_layer_p = jnp.pad(w_layer, ((0, 0), (0, OUT_PAD - D_OUT))).astype(jnp.bfloat16)
    b_layer_p = jnp.pad(b_layer, (0, OUT_PAD - D_OUT)).reshape(1, OUT_PAD)

    return {
        "emb": emb,
        "w_proj": w_proj_p, "b_proj": b_proj_p,
        "w_layer": w_layer_p, "b_layer": b_layer_p,
    }


# -------------------------------- forward pass --------------------------------
def custom_model_forward(input_ids, params):
    assert input_ids.shape[0] == INPUT_DIM * 2

    # torch.split(input_ids, self.input_dim)
    tokens = input_ids[:INPUT_DIM].astype(jnp.int32)     # token ids for the backbone
    labels = input_ids[INPUT_DIM:].astype(jnp.float32)   # labels to concatenate

    # place labels in lanes 120..127 so the in-kernel concat is a vector add
    labels_pad = jnp.pad(labels, (CODEBERT_OUT, 0)).reshape(1, C_PAD)

    out_pad = pl.pallas_call(
        fused_forward_kernel,
        out_shape=jax.ShapeDtypeStruct((1, OUT_PAD), jnp.float32),
        grid_spec=pltpu.PrefetchScalarGridSpec(
            num_scalar_prefetch=1,          # tokens -> SMEM
            grid=(1,),
            in_specs=[
                pl.BlockSpec((VOCAB, EMB_DIM), lambda i, tok: (0, 0)),
                pl.BlockSpec((1, C_PAD), lambda i, tok: (0, 0)),
                pl.BlockSpec((EMB_DIM, C_PAD), lambda i, tok: (0, 0)),
                pl.BlockSpec((1, C_PAD), lambda i, tok: (0, 0)),
                pl.BlockSpec((C_PAD, OUT_PAD), lambda i, tok: (0, 0)),
                pl.BlockSpec((1, OUT_PAD), lambda i, tok: (0, 0)),
            ],
            out_specs=pl.BlockSpec((1, OUT_PAD), lambda i, tok: (0, 0)),
        ),
    )(tokens, params["emb"], labels_pad,
      params["w_proj"], params["b_proj"],
      params["w_layer"], params["b_layer"])

    # final_output_tensor = self.layer(ll_input)  -> (d,)
    return out_pad[0, :D_OUT]


# ----------------------------------- driver -----------------------------------
if __name__ == "__main__":
    key = jax.random.PRNGKey(0)
    k_params, k_tok, k_lab = jax.random.split(key, 3)

    params = init_params(k_params)

    # input_ids: first half integer token ids, second half float labels,
    # stored together as float32 (mirrors the torch tensor of shape (2*input_dim,))
    tokens = jax.random.randint(k_tok, (INPUT_DIM,), 0, VOCAB).astype(jnp.float32)
    labels = jax.random.normal(k_lab, (INPUT_DIM,), jnp.float32)
    input_ids = jnp.concatenate([tokens, labels], axis=0)      # (16,)

    out = jax.jit(custom_model_forward)(input_ids, params)
    out = jax.block_until_ready(out)
    assert out.shape == (D_OUT,) and out.dtype == jnp.float32
    assert bool(jnp.all(jnp.isfinite(out)))

    print("KERNEL_OK")
</pallas_src>

<mosaic_0001>
module attributes {stable_mosaic.version = 11 : i64} {
  func.func @fused_forward_kernel(%arg0: i32, %arg1: memref<8xi32, #tpu.memory_space<smem>>, %arg2: memref<64x128xf32, #tpu.memory_space<vmem>>, %arg3: memref<1x128xf32, #tpu.memory_space<vmem>>, %arg4: memref<128x128xbf16, #tpu.memory_space<vmem>>, %arg5: memref<1x128xf32, #tpu.memory_space<vmem>>, %arg6: memref<128x128xbf16, #tpu.memory_space<vmem>>, %arg7: memref<1x128xf32, #tpu.memory_space<vmem>>, %arg8: memref<1x128xf32, #tpu.memory_space<vmem>>) attributes {dimension_semantics = [#tpu.dimension_semantics<arbitrary>], iteration_bounds = array<i64: 1>, scalar_prefetch = 1 : i64, scratch_operands = 0 : i64, tpu.core_type = #tpu.core_type<tc>, window_params = [{pipeline_mode = #tpu.pipeline_mode<synchronous>, transform_indices = @transform_0, window_bounds = array<i64: 64, 128>}, {pipeline_mode = #tpu.pipeline_mode<synchronous>, transform_indices = @transform_1, window_bounds = array<i64: 1, 128>}, {pipeline_mode = #tpu.pipeline_mode<synchronous>, transform_indices = @transform_2, window_bounds = array<i64: 128, 128>}, {pipeline_mode = #tpu.pipeline_mode<synchronous>, transform_indices = @transform_3, window_bounds = array<i64: 1, 128>}, {pipeline_mode = #tpu.pipeline_mode<synchronous>, transform_indices = @transform_4, window_bounds = array<i64: 128, 128>}, {pipeline_mode = #tpu.pipeline_mode<synchronous>, transform_indices = @transform_5, window_bounds = array<i64: 1, 128>}, {pipeline_mode = #tpu.pipeline_mode<synchronous>, transform_indices = @transform_6, window_bounds = array<i64: 1, 128>}]} {
    %cst = arith.constant 0.000000e+00 : f32
    %0 = vector.broadcast %cst : f32 to vector<1x128xf32>
    %c0_i32 = arith.constant 0 : i32
    %1 = arith.index_cast %c0_i32 : i32 to index
    %2 = memref.load %arg1[%1] : memref<8xi32, #tpu.memory_space<smem>>
    %3 = arith.index_cast %2 : i32 to index
    %c0 = arith.constant 0 : index
    %4 = vector.load %arg2[%3, %c0] : memref<64x128xf32, #tpu.memory_space<vmem>>, vector<1x128xf32>
    %5 = arith.addf %0, %4 : vector<1x128xf32>
    %c1_i32 = arith.constant 1 : i32
    %6 = arith.index_cast %c1_i32 : i32 to index
    %7 = memref.load %arg1[%6] : memref<8xi32, #tpu.memory_space<smem>>
    %8 = arith.index_cast %7 : i32 to index
    %c0_0 = arith.constant 0 : index
    %9 = vector.load %arg2[%8, %c0_0] : memref<64x128xf32, #tpu.memory_space<vmem>>, vector<1x128xf32>
    %10 = arith.addf %5, %9 : vector<1x128xf32>
    %c2_i32 = arith.constant 2 : i32
    %11 = arith.index_cast %c2_i32 : i32 to index
    %12 = memref.load %arg1[%11] : memref<8xi32, #tpu.memory_space<smem>>
    %13 = arith.index_cast %12 : i32 to index
    %c0_1 = arith.constant 0 : index
    %14 = vector.load %arg2[%13, %c0_1] : memref<64x128xf32, #tpu.memory_space<vmem>>, vector<1x128xf32>
    %15 = arith.addf %10, %14 : vector<1x128xf32>
    %c3_i32 = arith.constant 3 : i32
    %16 = arith.index_cast %c3_i32 : i32 to index
    %17 = memref.load %arg1[%16] : memref<8xi32, #tpu.memory_space<smem>>
    %18 = arith.index_cast %17 : i32 to index
    %c0_2 = arith.constant 0 : index
    %19 = vector.load %arg2[%18, %c0_2] : memref<64x128xf32, #tpu.memory_space<vmem>>, vector<1x128xf32>
    %20 = arith.addf %15, %19 : vector<1x128xf32>
    %c4_i32 = arith.constant 4 : i32
    %21 = arith.index_cast %c4_i32 : i32 to index
    %22 = memref.load %arg1[%21] : memref<8xi32, #tpu.memory_space<smem>>
    %23 = arith.index_cast %22 : i32 to index
    %c0_3 = arith.constant 0 : index
    %24 = vector.load %arg2[%23, %c0_3] : memref<64x128xf32, #tpu.memory_space<vmem>>, vector<1x128xf32>
    %25 = arith.addf %20, %24 : vector<1x128xf32>
    %c5_i32 = arith.constant 5 : i32
    %26 = arith.index_cast %c5_i32 : i32 to index
    %27 = memref.load %arg1[%26] : memref<8xi32, #tpu.memory_space<smem>>
    %28 = arith.index_cast %27 : i32 to index
    %c0_4 = arith.constant 0 : index
    %29 = vector.load %arg2[%28, %c0_4] : memref<64x128xf32, #tpu.memory_space<vmem>>, vector<1x128xf32>
    %30 = arith.addf %25, %29 : vector<1x128xf32>
    %c6_i32 = arith.constant 6 : i32
    %31 = arith.index_cast %c6_i32 : i32 to index
    %32 = memref.load %arg1[%31] : memref<8xi32, #tpu.memory_space<smem>>
    %33 = arith.index_cast %32 : i32 to index
    %c0_5 = arith.constant 0 : index
    %34 = vector.load %arg2[%33, %c0_5] : memref<64x128xf32, #tpu.memory_space<vmem>>, vector<1x128xf32>
    %35 = arith.addf %30, %34 : vector<1x128xf32>
    %c7_i32 = arith.constant 7 : i32
    %36 = arith.index_cast %c7_i32 : i32 to index
    %37 = memref.load %arg1[%36] : memref<8xi32, #tpu.memory_space<smem>>
    %38 = arith.index_cast %37 : i32 to index
    %c0_6 = arith.constant 0 : index
    %39 = vector.load %arg2[%38, %c0_6] : memref<64x128xf32, #tpu.memory_space<vmem>>, vector<1x128xf32>
    %40 = arith.addf %35, %39 : vector<1x128xf32>
    %c8_i32 = arith.constant 8 : i32
    %cst_7 = arith.constant 1.250000e-01 : f32
    %41 = vector.broadcast %cst_7 : f32 to vector<1x128xf32>
    %42 = arith.mulf %40, %41 : vector<1x128xf32>
    %43 = arith.truncf %42 : vector<1x128xf32> to vector<1x128xbf16>
    %c0_8 = arith.constant 0 : index
    %c0_9 = arith.constant 0 : index
    %44 = vector.load %arg4[%c0_8, %c0_9] : memref<128x128xbf16, #tpu.memory_space<vmem>>, vector<128x128xbf16>
    %cst_10 = arith.constant dense<0.000000e+00> : vector<1x128xf32>
    %45 = tpu.matmul %43, %44, %cst_10 {dimension_numbers = #tpu.dot_dimension_numbers<[1], [0], [0], [1], [0, 0, 1, 1], [], []>} : vector<1x128xbf16>, vector<128x128xbf16>, vector<1x128xf32> -> vector<1x128xf32>
    %c0_11 = arith.constant 0 : index
    %c0_12 = arith.constant 0 : index
    %46 = vector.load %arg5[%c0_11, %c0_12] : memref<1x128xf32, #tpu.memory_space<vmem>>, vector<1x128xf32>
    %47 = arith.addf %45, %46 : vector<1x128xf32>
    %48 = math.tanh %47 : vector<1x128xf32>
    %c0_13 = arith.constant 0 : index
    %c0_14 = arith.constant 0 : index
    %49 = vector.load %arg3[%c0_13, %c0_14] : memref<1x128xf32, #tpu.memory_space<vmem>>, vector<1x128xf32>
    %50 = arith.addf %48, %49 : vector<1x128xf32>
    %51 = arith.truncf %50 : vector<1x128xf32> to vector<1x128xbf16>
    %c0_15 = arith.constant 0 : index
    %c0_16 = arith.constant 0 : index
    %52 = vector.load %arg6[%c0_15, %c0_16] : memref<128x128xbf16, #tpu.memory_space<vmem>>, vector<128x128xbf16>
    %cst_17 = arith.constant dense<0.000000e+00> : vector<1x128xf32>
    %53 = tpu.matmul %51, %52, %cst_17 {dimension_numbers = #tpu.dot_dimension_numbers<[1], [0], [0], [1], [0, 0, 1, 1], [], []>} : vector<1x128xbf16>, vector<128x128xbf16>, vector<1x128xf32> -> vector<1x128xf32>
    %c0_18 = arith.constant 0 : index
    %c0_19 = arith.constant 0 : index
    %54 = vector.load %arg7[%c0_18, %c0_19] : memref<1x128xf32, #tpu.memory_space<vmem>>, vector<1x128xf32>
    %55 = arith.addf %53, %54 : vector<1x128xf32>
    %c0_20 = arith.constant 0 : index
    %c0_21 = arith.constant 0 : index
    %56 = vector.load %arg8[%c0_20, %c0_21] : memref<1x128xf32, #tpu.memory_space<vmem>>, vector<1x128xf32>
    tpu.vector_store %arg8[%c0_20, %c0_21], %55 {strides = array<i32>} : memref<1x128xf32, #tpu.memory_space<vmem>>, vector<1x128xf32>,
    return
  }
  func.func @transform_0(%arg0: i32, %arg1: memref<8xi32, #tpu.memory_space<smem>>) -> (i32, i32) {
    %c0_i32 = arith.constant 0 : i32
    %c0_i32_0 = arith.constant 0 : i32
    %c0_i32_1 = arith.constant 0 : i32
    return %c0_i32, %c0_i32_0 : i32, i32
  }
  func.func @transform_1(%arg0: i32, %arg1: memref<8xi32, #tpu.memory_space<smem>>) -> (i32, i32) {
    %c0_i32 = arith.constant 0 : i32
    %c0_i32_0 = arith.constant 0 : i32
    %c0_i32_1 = arith.constant 0 : i32
    return %c0_i32, %c0_i32_0 : i32, i32
  }
  func.func @transform_2(%arg0: i32, %arg1: memref<8xi32, #tpu.memory_space<smem>>) -> (i32, i32) {
    %c0_i32 = arith.constant 0 : i32
    %c0_i32_0 = arith.constant 0 : i32
    %c0_i32_1 = arith.constant 0 : i32
    return %c0_i32, %c0_i32_0 : i32, i32
  }
  func.func @transform_3(%arg0: i32, %arg1: memref<8xi32, #tpu.memory_space<smem>>) -> (i32, i32) {
    %c0_i32 = arith.constant 0 : i32
    %c0_i32_0 = arith.constant 0 : i32
    %c0_i32_1 = arith.constant 0 : i32
    return %c0_i32, %c0_i32_0 : i32, i32
  }
  func.func @transform_4(%arg0: i32, %arg1: memref<8xi32, #tpu.memory_space<smem>>) -> (i32, i32) {
    %c0_i32 = arith.constant 0 : i32
    %c0_i32_0 = arith.constant 0 : i32
    %c0_i32_1 = arith.constant 0 : i32
    return %c0_i32, %c0_i32_0 : i32, i32
  }
  func.func @transform_5(%arg0: i32, %arg1: memref<8xi32, #tpu.memory_space<smem>>) -> (i32, i32) {
    %c0_i32 = arith.constant 0 : i32
    %c0_i32_0 = arith.constant 0 : i32
    %c0_i32_1 = arith.constant 0 : i32
    return %c0_i32, %c0_i32_0 : i32, i32
  }
  func.func @transform_6(%arg0: i32, %arg1: memref<8xi32, #tpu.memory_space<smem>>) -> (i32, i32) {
    %c0_i32 = arith.constant 0 : i32
    %c0_i32_0 = arith.constant 0 : i32
    %c0_i32_1 = arith.constant 0 : i32
    return %c0_i32, %c0_i32_0 : i32, i32
  }
}

</mosaic_0001>

<bundles_post_ra>
// kernel: custom_model_forward.1
= control target key start
LH: loop header
LB: loop body
LE: loop exit
PB: predicated region body
PF: predicated region fallthrough
CT: control target
= control target key end

     0   :  { %s662_s0 = inlined_call_operand.vmem [shape: s32[8], index: 0, kind: input, shape index: {}]   ;;  %s663_s1 = inlined_call_operand.hbm [shape: f32[64,128], index: 1, kind: input, shape index: {}]   ;;  %s664_s2 = inlined_call_operand.vmem [shape: f32[1,128], index: 2, kind: input, shape index: {}]   ;;  %s665_s3 = inlined_call_operand.hbm [shape: bf16[128,128], index: 3, kind: input, shape index: {}]   ;;  %s666_s4 = inlined_call_operand.vmem [shape: f32[1,128], index: 4, kind: input, shape index: {}]   ;;  %s667_s5 = inlined_call_operand.hbm [shape: bf16[128,128], index: 5, kind: input, shape index: {}]   ;;  %s668_s6 = inlined_call_operand.vmem [shape: f32[1,128], index: 6, kind: input, shape index: {}]   ;;  %s669_s7 = inlined_call_operand.vmem [shape: f32[1,128], index: 7, kind: output, shape index: {}]  }
   0x1   :  { %s12_s26 = sshll.u32 %s662_s0, 4  ;;  %s13_s26 = int_to_ptr.vmem [resolvable:$true] %s12_s26 }
   0x2   :  { %s444_s27 = scalar_lea.vmem %s13_s26, 16  ;;  %p449_p1 = scmp.lt.s32.totalorder %s13_s26, %s13_s26 }
   0x3   :  { %p445_p0 = scmp.ne.s32.totalorder %s13_s26, %s444_s27  ;;  %p450_p2 = scmp.lt.s32.totalorder %s444_s27, %s444_s27 }
   0x5   :  { %p451_p3 = por %p450_p2, %p449_p1 }
   0x7   :  { %p452_p4 = pnand %p451_p3, %p445_p0 }
   0x9   :  { %455 = shalt.err (!%p452_p4)  }
   0xa   :  { %s528_s28 = smov [#allocation3]  }
   0xb   :  { %15 = dma.vmem_to_smem %s13_s26, 16, %s528_s28, [#allocation2] }
   0xc   :  { %522 = dma.done.wait [#allocation2], 16 }
   0xd   :  { %523 = vsyncadd [#allocation2], 4294967280 }
   0xe   :  { %17 = sfence }
   0xf   :  { %18 = vsyncpa [#allocation5], 0 }
  0x10   :  { %19 = vsyncpa [#allocation7], 0  ;;  %s529_s29 = smov [#allocation6]   ;;  %s456_s9 = scalar_lea.hbm %s665_s3, 1024 }
  0x11   :  { %s39_s30 = sshll.u32 %s529_s29, 4  ;;  %p457_p5 = scmp.ne.s32.totalorder %s665_s3, %s456_s9  ;;  %s40_s30 = int_to_ptr.vmem [resolvable:$true] %s39_s30 }
  0x12   :  { %p460_p6 = scmp.lt.u32.totalorder %s456_s9, %s665_s3 }
  0x14   :  { %p462_p7 = pnand %p460_p6, %p457_p5 }
  0x16   :  { %465 = shalt.err (!%p462_p7)
}
  0x17   :  { %s466_s14 = scalar_lea.vmem %s40_s30, 1024  ;;  %p471_p9 = scmp.lt.s32.totalorder %s40_s30, %s40_s30 }
  0x18   :  { %p467_p8 = scmp.ne.s32.totalorder %s40_s30, %s466_s14  ;;  %p472_p10 = scmp.lt.s32.totalorder %s466_s14, %s466_s14 }
  0x1a   :  { %p473_p11 = por %p472_p10, %p471_p9 }
  0x1c   :  { %p474_p12 = pnand %p473_p11, %p467_p8 }
  0x1e   :  { %477 = shalt.err (!%p474_p12)
}
  0x1f   :  { %s530_s15 = smov 64   ;;  %s531_s16 = smov 4  }
  0x20   :  { %45 = dma.hbm_to_vmem [thread:$0]  %s665_s3, 1024, %s40_s30, [#allocation7], %s530_s15, %s530_s15, %s531_s16  }
  0x21   :  { %s532_s19 = smov [#allocation4]   ;;  %s478_s23 = scalar_lea.hbm %s663_s1, 1024 }
  0x22   :  { %s25_s20 = sshll.u32 %s532_s19, 4  ;;  %p479_p13 = scmp.ne.s32.totalorder %s663_s1, %s478_s23  ;;  %s26_s20 = int_to_ptr.vmem [resolvable:$true] %s25_s20 }
  0x23   :  { %p482_p0 = scmp.lt.u32.totalorder %s478_s23, %s663_s1 }
  0x25   :  { %p484_p1 = pnand %p482_p0, %p479_p13 }
  0x27   :  { %487 = shalt.err (!%p484_p1)
}
  0x28   :  { %s488_s28 = scalar_lea.vmem %s26_s20, 1024  ;;  %p493_p3 = scmp.lt.s32.totalorder %s26_s20, %s26_s20 }
  0x29   :  { %p489_p2 = scmp.ne.s32.totalorder %s26_s20, %s488_s28  ;;  %p494_p4 = scmp.lt.s32.totalorder %s488_s28, %s488_s28 }
  0x2b   :  { %p495_p5 = por %p494_p4, %p493_p3 }
  0x2d   :  { %p496_p6 = pnand %p495_p5, %p489_p2 }
  0x2f   :  { %499 = shalt.err (!%p496_p6)
}
  0x30   :  { %s533_s3 = smov 128   ;;  %s534_s29 = smov 8  }
  0x31   :  { %31 = dma.hbm_to_vmem [thread:$0]  %s663_s1, 1024, %s26_s20, [#allocation5], %s533_s3, %s533_s3, %s534_s29  }
  0x32   :  { %s535_s0 = smov [#allocation8]   ;;  %s500_s12 = scalar_lea.hbm %s667_s5, 1024 }
  0x33   :  { %s53_s9 = sshll.u32 %s535_s0, 4  ;;  %p501_p7 = scmp.ne.s32.totalorder %s667_s5, %s500_s12  ;;  %s54_s9 = int_to_ptr.vmem [resolvable:$true] %s53_s9 }
  0x34   :  { %p504_p8 = scmp.lt.u32.totalorder %s500_s12, %s667_s5 }
  0x36   :  { %p506_p9 = pnand %p504_p8, %p501_p7 }
  0x38   :  { %509 = shalt.err (!%p506_p9)
}
  0x39   :  { %s510_s19 = scalar_lea.vmem %s54_s9, 1024  ;;  %p515_p11 = scmp.lt.s32.totalorder %s54_s9, %s54_s9 }
  0x3a   :  { %p511_p10 = scmp.ne.s32.totalorder %s54_s9, %s510_s19  ;;  %p516_p12 = scmp.lt.s32.totalorder %s510_s19, %s510_s19 }
  0x3c   :  { %p517_p13 = por %p516_p12, %p515_p11 }
  0x3e   :  { %p518_p0 = pnand %p517_p13, %p511_p10 }
  0x40   :  { %521 = shalt.err (!%p518_p0)
}
  0x41   :  { %59 = dma.hbm_to_vmem [thread:$0]  %s667_s5, 1024, %s54_s9, [#allocation7], %s530_s15, %s530_s15, %s531_s16  }
  0x42   :  { %524 = dma.done.wait [#allocation5], 1024  }
  0x43   :  { %525 = vsyncadd [#allocation5], 4294966272 }
  0x44   :  { %526 = dma.done.wait [#allocation7], 2048  }
  0x45   :  { %527 = vsyncadd [#allocation7], 4294965248  ;;  %v536_v0 = vmov 0.0   ;;  %vm537_vm0 = vmmov 0   ;;  %s72_s21 = sld [smem:[#allocation3]]  ;;  %s335_s22 = sld [smem:[#allocation3 + $0x1]] }
  0x46   :  { %376 = vmatprep.subr.bf16.mxu0 %v536_v0  ;;  %392 = vmatprep.mubr.msk.bf16.mxu0 %vm537_vm0, %v536_v0  ;;  %s336_s23 = sld [smem:[#allocation3 + $0x2]]  ;;  %s337_s24 = sld [smem:[#allocation3 + $0x3]]  ;;  %v426_v1 = vld [vmem:[#allocation6] sm:$0xff]   ;;  %v427_v2 = vld [vmem:[#allocation6 + $0x8] sm:$0xff]   ;;  %v428_v3 = vld [vmem:[#allocation6 + $0x10] sm:$0xff]  }
  0x47   :  { %396 = vmatprep.subr.bf16.mxu1 %v536_v0  ;;  %412 = vmatprep.mubr.msk.bf16.mxu1 %vm537_vm0, %v536_v0  ;;  %s338_s25 = sld [smem:[#allocation3 + $0x4]]  ;;  %s627_s5 = sld [smem:[#allocation3 + $0x5]]  ;;  %v429_v8 = vld [vmem:[#allocation6 + $0x18] sm:$0xff]   ;;  %v434_v11 = vld [vmem:[#allocation8] sm:$0xff]   ;;  %v435_v15 = vld [vmem:[#allocation8 + $0x8] sm:$0xff]  }
  0x48   :  { %s629_s15 = sld [smem:[#allocation3 + $0x6]]  ;;  %377 = vmatpush3.bf16.msra.mxu0 %v426_v1  ;;  %s632_s16 = sld [smem:[#allocation3 + $0x7]]  ;;  %v430_v12 = vld [vmem:[#allocation6 + $0x20] sm:$0xff]   ;;  %397 = vmatpush3.bf16.msra.mxu1 %v434_v11  ;;  %v436_v20 = vld [vmem:[#allocation8 + $0x10] sm:$0xff]   ;;  %v431_v21 = vld [vmem:[#allocation6 + $0x28] sm:$0xff]  }
  0x49   :  { %378 = vmatprep.subr.bf16.mxu0 %v536_v0  ;;  %398 = vmatprep.subr.bf16.mxu1 %v536_v0  ;;  %v437_v25 = vld [vmem:[#allocation8 + $0x18] sm:$0xff]   ;;  %v432_v26 = vld [vmem:[#allocation6 + $0x30] sm:$0xff]   ;;  %v438_v30 = vld [vmem:[#allocation8 + $0x20] sm:$0xff]  }
  0x4a   :  { %v433_v28 = vld [vmem:[#allocation6 + $0x38] sm:$0xff]   ;;  %v439_v31 = vld [vmem:[#allocation8 + $0x28] sm:$0xff]   ;;  %v440_v32 = vld [vmem:[#allocation8 + $0x30] sm:$0xff]  }
  0x4b   :  { %s73_s26 = scalar_lea.vmem [#allocation4], %s72_s21  ;;  %s77_s27 = scalar_lea.vmem [#allocation4], %s335_s22  ;;  %v441_v33 = vld [vmem:[#allocation8 + $0x38] sm:$0xff]   ;;  %v122_v34 = vld [vmem:[%s666_s4] sm:$0x1] }
  0x4c   :  { %379 = vmatpush3.bf16.msra.mxu0 %v427_v2  ;;  %v74_v4 = vld [vmem:[%s73_s26] sm:$0x1]  ;;  %s81_s28 = scalar_lea.vmem [#allocation4], %s336_s23  ;;  %s85_s3 = scalar_lea.vmem [#allocation4], %s337_s24  ;;  %399 = vmatpush3.bf16.msra.mxu1 %v435_v15 }
  0x4d   :  { %380 = vmatprep.subr.bf16.mxu0 %v536_v0  ;;  %v78_v5 = vld [vmem:[%s77_s27] sm:$0x1]  ;;  %s89_s29 = scalar_lea.vmem [#allocation4], %s338_s25  ;;  %s93_s30 = scalar_lea.vmem [#allocation4], %s627_s5  ;;  %400 = vmatprep.subr.bf16.mxu1 %v536_v0 }
  0x4e   :  { %v82_v6 = vld [vmem:[%s81_s28] sm:$0x1]  ;;  %v79_v7 = vadd.f32 %v78_v5, %v74_v4  ;;  %s97_s8 = scalar_lea.vmem [#allocation4], %s629_s15  ;;  %s101_s0 = scalar_lea.vmem [#allocation4], %s632_s16 }
  0x4f   :  { %v86_v9 = vld [vmem:[%s85_s3] sm:$0x1] }
  0x50   :  { %381 = vmatpush3.bf16.msra.mxu0 %v428_v3  ;;  %v83_v10 = vadd.f32 %v82_v6, %v79_v7  ;;  %v90_v13 = vld [vmem:[%s89_s29] sm:$0x1]  ;;  %401 = vmatpush3.bf16.msra.mxu1 %v436_v20 }
  0x51   :  { %382 = vmatprep.subr.bf16.mxu0 %v536_v0  ;;  %v94_v16 = vld [vmem:[%s93_s30] sm:$0x1]  ;;  %402 = vmatprep.subr.bf16.mxu1 %v536_v0 }
  0x52   :  { %v87_v14 = vadd.f32 %v86_v9, %v83_v10  ;;  %v98_v17 = vld [vmem:[%s97_s8] sm:$0x1] }
  0x53   :  { %v102_v22 = vld [vmem:[%s101_s0] sm:$0x1] }
  0x54   :  { %383 = vmatpush3.bf16.msra.mxu0 %v429_v8  ;;  %v91_v18 = vadd.f32 %v90_v13, %v87_v14  ;;  %403 = vmatpush3.bf16.msra.mxu1 %v437_v25  ;;  %v212_v40 = vld [vmem:[%s664_s2] sm:$0x1] }
  0x55   :  { %384 = vmatprep.subr.bf16.mxu0 %v536_v0  ;;  %404 = vmatprep.subr.bf16.mxu1 %v536_v0  ;;  %v231_v44 = vld [vmem:[%s668_s6] sm:$0x1] }
  0x56   :  { %v95_v19 = vadd.f32 %v94_v16, %v91_v18 }
  0x58   :  { %385 = vmatpush3.bf16.msra.mxu0 %v430_v12  ;;  %v99_v23 = vadd.f32 %v98_v17, %v95_v19  ;;  %405 = vmatpush3.bf16.msra.mxu1 %v438_v30 }
  0x59   :  { %386 = vmatprep.subr.bf16.mxu0 %v536_v0  ;;  %406 = vmatprep.subr.bf16.mxu1 %v536_v0 }
  0x5a   :  { %v103_v24 = vadd.f32 %v102_v22, %v99_v23 }
  0x5c   :  { %387 = vmatpush3.bf16.msra.mxu0 %v431_v21  ;;  %v104_v27 = vmul.f32 0.125, %v103_v24  ;;  %407 = vmatpush3.bf16.msra.mxu1 %v439_v31 }
  0x5d   :  { %388 = vmatprep.subr.bf16.mxu0 %v536_v0  ;;  %408 = vmatprep.subr.bf16.mxu1 %v536_v0 }
  0x5e   :  { %v105_v29 = vpack.c.bf16 %v104_v27, %v104_v27 }
  0x60   :  { %389 = vmatpush3.bf16.msra.mxu0 %v432_v26  ;;  %409 = vmatpush3.bf16.msra.mxu1 %v440_v32 }
  0x61   :  { %390 = vmatprep.subr.bf16.mxu0 %v536_v0  ;;  %410 = vmatprep.subr.bf16.mxu1 %v536_v0 }
  0x64   :  { %391 = vmatpush3.bf16.msra.mxu0 %v433_v28  ;;  %411 = vmatpush3.bf16.msra.mxu1 %v441_v33 }
  0x67   :  { %393 = vmatmul.mubr.bf16.vlgmr.msra.gmra.mrb[0].mxu0 %v105_v29 }
 0x13a   :  { %v205_v35 = vpop.f32.mrb[0].mxu0 }
 0x13b   :  { %v206_v36 = vadd.f32 %v205_v35, %v122_v34  ;;  %v394_v37 = vpop.f32.mrb[1].mxu0 }
 0x13c   :  { %v208_v38 = vpop.f32.mrb[2].mxu0 }
 0x13d   :  { %442 = vtanh.f32 %v206_v36  ;;  %v395_v39 = vpop.f32.mrb[3].mxu0 }
 0x147   :  { %v443_v41 = vpop.eup %442 }
 0x148   :  { %v213_v42 = vadd.f32 %v443_v41, %v212_v40 }
 0x14a   :  { %v214_v43 = vpack.c.bf16 %v213_v42, %v213_v42 }
 0x14c   :  { %413 = vmatmul.mubr.bf16.vlgmr.msra.gmra.mrb[0].mxu1 %v214_v43 }
 0x21f   :  { %v314_v45 = vpop.f32.mrb[0].mxu1 }
 0x220   :  { %v315_v46 = vadd.f32 %v314_v45, %v231_v44  ;;  %v414_v47 = vpop.f32.mrb[1].mxu1 }
 0x221   :  { %v317_v48 = vpop.f32.mrb[2].mxu1 }
 0x222   :  { %320 = vst [vmem:[%s669_s7] sm:$0x1] %v315_v46  ;;  %v415_v49 = vpop.f32.mrb[3].mxu1 }
 0x223   :  { %325 = vsyncpa [#allocation5], 1 }
 0x224   :  { %326 = vsyncpa [#allocation7], 1 }

</bundles_post_ra>
